<compile_context>
chip_gen: v5e
topology: v5e:2x2
jax: 0.10.0
libtpu: 0.0.40
codegen_flags: <defaults>
</compile_context>

<pallas_src>
import functools

import jax
import jax.numpy as jnp
from jax.experimental import pallas as pl
from jax.experimental.pallas import tpu as pltpu

BN_EPS = 1e-5
LEAKY_SLOPE = 0.01  # nn.LeakyReLU() default negative_slope


def _round_up(x, m):
    return (x + m - 1) // m * m


def _floor_pow2(x):
    return 1 << (max(1, int(x)).bit_length() - 1)


def _pick_tile_m(M, Kp, OCp, vmem_budget_bytes=10 * 1024 * 1024, cap=2048):
    """Largest 8*2^k row tile whose pass-1 per-step VMEM footprint fits the budget.

    footprint ~ 2*tile*(Kp*2 + OCp*4)   # double-buffered bf16 patches in, f32 z out
              + 2*Kp*OCp*2              # resident bf16 weight (still double-buffered)
              + 4*8*OCp*4               # (8, OCp) f32 sum/sumsq accumulators
    """
    fixed = 2 * Kp * OCp * 2 + 4 * 8 * OCp * 4
    per_row = 2 * (Kp * 2 + OCp * 4)
    t = max(8, (vmem_budget_bytes - fixed) // per_row)
    t = min(t, cap, _round_up(M, 8))
    return max(16, 8 * _floor_pow2(t // 8))


def _fold_rows(a):
    """Pairwise-fold rows down to an (8, lanes) slab.

    Only sublane-aligned static slices + vreg adds (VPU); no cross-sublane XLU
    reduction and pairwise (more accurate) f32 summation.  Requires
    a.shape[0] == 8 * 2^k.
    """
    while a.shape[0] > 8:
        h = a.shape[0] // 2
        a = a[:h] + a[h:]
    return a


def _conv_stats_kernel(p_ref, w_ref, z_ref, sum_ref, sq_ref):
    """Pass 1: bf16 conv matmul -> f32 z tile + per-channel partial sum/sumsq.

    p_ref  : (TILE_M, Kp)  bf16 im2col patch tile (zero rows/cols: exact no-ops)
    w_ref  : (Kp, OCp)     bf16 conv weight (constant block index -> resident)
    z_ref  : (TILE_M, OCp) f32 conv output tile (streamed to HBM, reused by pass 2)
    sum_ref: (8, OCp)      f32 partial per-channel sums    (resident accumulator)
    sq_ref : (8, OCp)      f32 partial per-channel sumsqs  (resident accumulator)
    """
    @pl.when(pl.program_id(0) == 0)
    def _():
        sum_ref[...] = jnp.zeros_like(sum_ref)
        sq_ref[...] = jnp.zeros_like(sq_ref)

    z = jnp.dot(p_ref[...], w_ref[...], preferred_element_type=jnp.float32)
    z_ref[...] = z
    sum_ref[...] += _fold_rows(z)
    sq_ref[...] += _fold_rows(z * z)


def _bn_act_kernel(z_ref, s_ref, t_ref, o_ref):
    """Pass 2: y = z*s + t ; LeakyReLU(max(y, a*y)).  Pure VPU / HBM-bound."""
    y = z_ref[...] * s_ref[...] + t_ref[...]
    o_ref[...] = jnp.maximum(y, LEAKY_SLOPE * y).astype(o_ref.dtype)


@functools.partial(jax.jit,
                   static_argnames=("stride", "padding", "padding_mod", "tile_m"))
def conv_block_forward(x_nchw, weight, bias, gamma, beta, *, stride=1,
                       padding=0, padding_mod="zeros", tile_m=None):
    """ConvBlock forward (training-mode BatchNorm + LeakyReLU).

    x_nchw : (N, C, H, W)    float32
    weight : (OC, C, KH, KW) float32  (PyTorch Conv2d layout)
    bias   : (OC,)  Conv2d bias.  It is exactly cancelled by the BatchNorm
                    batch-mean subtraction, so it is dropped in the kernel.
                    This is only valid for training-mode BN (batch stats);
                    do NOT reuse this kernel for eval-mode running stats.
    gamma, beta : (OC,) BatchNorm2d affine parameters
    tile_m : override row-tile size (rounded to 8*2^k); None -> auto from VMEM.
    returns: (N, OC, OH, OW) float32
    """
    del bias  # cancelled by training-mode BatchNorm mean subtraction (see docstring)
    N, C, H, W = x_nchw.shape
    OC, _, KH, KW = weight.shape

    # NCHW -> NHWC; cast to bf16 for the MXU (accumulation stays f32).
    x = jnp.transpose(x_nchw, (0, 2, 3, 1)).astype(jnp.bfloat16)

    # Padding (wrapper glue).
    if padding != 0:
        mode = "reflect" if padding_mod == "reflect" else "constant"
        x = jnp.pad(x, ((0, 0), (padding, padding), (padding, padding), (0, 0)),
                    mode=mode)

    Hp, Wp = H + 2 * padding, W + 2 * padding
    OH = (Hp - KH) // stride + 1
    OW = (Wp - KW) // stride + 1

    # im2col (wrapper glue): patches[(n,oh,ow), (kh,kw,c)], bf16, read ONCE.
    # TODO(synk): replace with a per-tap (KH*KW) in-kernel reduction grid.
    cols = []
    for kh in range(KH):
        for kw in range(KW):
            cols.append(x[:, kh:kh + (OH - 1) * stride + 1:stride,
                          kw:kw + (OW - 1) * stride + 1:stride, :])
    patches = jnp.stack(cols, axis=3)                 # (N, OH, OW, KH*KW, C)
    M = N * OH * OW
    K = KH * KW * C
    patches = patches.reshape(M, K)

    # MXU / lane-friendly padding (zero rows/cols are exact no-ops for both
    # the matmul and the statistics, since we divide by the true M below).
    Kp = _round_up(K, 128)
    OCp = _round_up(OC, 128)
    if tile_m is None:
        tm = _pick_tile_m(M, Kp, OCp)
    else:
        tm = max(16, 8 * _floor_pow2(max(8, min(int(tile_m), _round_up(M, 8))) // 8))
    Mp = _round_up(M, tm)
    num_tiles = Mp // tm

    patches = jnp.pad(patches, ((0, Mp - M), (0, Kp - K)))

    # (OC, C, KH, KW) -> (KH, KW, C, OC) -> (K, OC), matching im2col column order.
    w_mat = jnp.transpose(weight, (2, 3, 1, 0)).reshape(K, OC).astype(jnp.bfloat16)
    w_mat = jnp.pad(w_mat, ((0, Kp - K), (0, OCp - OC)))

    gamma_p = jnp.pad(gamma.astype(jnp.float32), (0, OCp - OC)).reshape(1, OCp)
    beta_p = jnp.pad(beta.astype(jnp.float32), (0, OCp - OC)).reshape(1, OCp)

    # ---- Pass 1: bf16 conv matmul (f32 acc) + per-channel sum / sumsq. ----
    z_flat, part_sum, part_sq = pl.pallas_call(
        _conv_stats_kernel,
        out_shape=(jax.ShapeDtypeStruct((Mp, OCp), jnp.float32),
                   jax.ShapeDtypeStruct((8, OCp), jnp.float32),
                   jax.ShapeDtypeStruct((8, OCp), jnp.float32)),
        grid=(num_tiles,),
        in_specs=[
            pl.BlockSpec((tm, Kp), lambda i: (i, 0)),
            pl.BlockSpec((Kp, OCp), lambda i: (0, 0)),
        ],
        out_specs=(pl.BlockSpec((tm, OCp), lambda i: (i, 0)),
                   pl.BlockSpec((8, OCp), lambda i: (0, 0)),
                   pl.BlockSpec((8, OCp), lambda i: (0, 0))),
        compiler_params=pltpu.CompilerParams(
            dimension_semantics=("arbitrary",)),
    )(patches, w_mat)

    # Tiny per-channel glue: final 8->1 reduce of the partials, then fold BN
    # (batch stats, biased variance) into a single scale/shift.  Divide by the
    # *true* M (zero-padded rows contributed exactly 0); clamp var >= 0.
    ch_sum = jnp.sum(part_sum, axis=0, keepdims=True)
    ch_sq = jnp.sum(part_sq, axis=0, keepdims=True)
    inv_m = 1.0 / float(M)
    mean = ch_sum * inv_m
    var = jnp.maximum(ch_sq * inv_m - mean * mean, 0.0)
    s = gamma_p * jax.lax.rsqrt(var + BN_EPS)
    t = beta_p - mean * s

    # ---- Pass 2: element-wise z*s + t + LeakyReLU over the stored z. ----
    out_flat = pl.pallas_call(
        _bn_act_kernel,
        out_shape=jax.ShapeDtypeStruct((Mp, OCp), jnp.float32),
        grid=(num_tiles,),
        in_specs=[
            pl.BlockSpec((tm, OCp), lambda i: (i, 0)),
            pl.BlockSpec((1, OCp), lambda i: (0, 0)),
            pl.BlockSpec((1, OCp), lambda i: (0, 0)),
        ],
        out_specs=pl.BlockSpec((tm, OCp), lambda i: (i, 0)),
        compiler_params=pltpu.CompilerParams(
            dimension_semantics=("parallel",)),
    )(z_flat, s, t)

    # (Mp, OCp) -> slice padding -> (N, OH, OW, OC) -> NCHW (module contract).
    out = out_flat[:M, :OC].reshape(N, OH, OW, OC)
    return jnp.transpose(out, (0, 3, 1, 2))


def _reference(x, weight, bias, gamma, beta, *, stride, padding, padding_mod,
               matmul_dtype=jnp.float32):
    """Pure-JAX reference of the PyTorch ConvBlock forward (training-mode BN).

    matmul_dtype=bfloat16 mirrors the kernel's MXU input precision; BN and the
    activation stay in float32 in both cases.
    """
    if padding != 0:
        mode = "reflect" if padding_mod == "reflect" else "constant"
        x = jnp.pad(x, ((0, 0), (0, 0), (padding, padding), (padding, padding)),
                    mode=mode)
    z = jax.lax.conv_general_dilated(
        x.astype(matmul_dtype), weight.astype(matmul_dtype),
        window_strides=(stride, stride), padding="VALID",
        dimension_numbers=("NCHW", "OIHW", "NCHW"),
        preferred_element_type=jnp.float32,
        precision=jax.lax.Precision.HIGHEST)
    z = z + bias[None, :, None, None]
    mean = jnp.mean(z, axis=(0, 2, 3), keepdims=True)
    var = jnp.mean((z - mean) ** 2, axis=(0, 2, 3), keepdims=True)
    zn = (z - mean) * jax.lax.rsqrt(var + BN_EPS)
    zn = zn * gamma[None, :, None, None] + beta[None, :, None, None]
    return jnp.where(zn >= 0, zn, LEAKY_SLOPE * zn)


if __name__ == "__main__":
    # ConvBlock(in_channels=4, out_channels=8, kernel_size=3, stride=1,
    #           padding=1, padding_mod='zeros', use_bn=True,
    #           use_activation='LeakyReLU')   -- training-mode BN forward.
    N, C, H, W = 2, 4, 16, 16
    OC, KH, KW = 8, 3, 3

    key = jax.random.PRNGKey(0)
    kx, kw_, kb, kg, kbe = jax.random.split(key, 5)

    x = jax.random.normal(kx, (N, C, H, W), dtype=jnp.float32)
    weight = 0.1 * jax.random.normal(kw_, (OC, C, KH, KW), dtype=jnp.float32)
    bias = 0.1 * jax.random.normal(kb, (OC,), dtype=jnp.float32)
    gamma = 1.0 + 0.1 * jax.random.normal(kg, (OC,), dtype=jnp.float32)
    beta = 0.1 * jax.random.normal(kbe, (OC,), dtype=jnp.float32)

    # tile_m=128 exercises a multi-tile grid (accumulator init + pipelining).
    out = conv_block_forward(x, weight, bias, gamma, beta,
                             stride=1, padding=1, padding_mod="zeros",
                             tile_m=128)
    jax.block_until_ready(out)
    assert out.shape == (N, OC, H, W), out.shape

    # tile_m=None exercises the VMEM-budget auto-sizer (single 512-row tile here).
    out_auto = conv_block_forward(x, weight, bias, gamma, beta,
                                  stride=1, padding=1, padding_mod="zeros")
    jax.block_until_ready(out_auto)

    ref_bf16 = _reference(x, weight, bias, gamma, beta, stride=1, padding=1,
                          padding_mod="zeros", matmul_dtype=jnp.bfloat16)
    ref_f32 = _reference(x, weight, bias, gamma, beta, stride=1, padding=1,
                         padding_mod="zeros", matmul_dtype=jnp.float32)

    err_matched = float(jnp.max(jnp.abs(out - ref_bf16)))   # same MXU precision
    err_f32 = float(jnp.max(jnp.abs(out - ref_f32)))        # vs full-f32 conv
    err_tiles = float(jnp.max(jnp.abs(out - out_auto)))     # tiling-invariance
    assert err_matched < 2e-3, f"max abs err vs bf16-matched ref {err_matched}"
    assert err_f32 < 1e-1, f"max abs err vs f32 ref {err_f32}"
    assert err_tiles < 1e-3, f"tile-size dependence {err_tiles}"
    print("KERNEL_OK")
</pallas_src>

<mosaic_0001>
module attributes {stable_mosaic.version = 11 : i64} {
  func.func @_conv_stats_kernel(%arg0: i32, %arg1: memref<128x128xbf16, #tpu.memory_space<vmem>>, %arg2: memref<128x128xbf16, #tpu.memory_space<vmem>>, %arg3: memref<128x128xf32, #tpu.memory_space<vmem>>, %arg4: memref<8x128xf32, #tpu.memory_space<vmem>>, %arg5: memref<8x128xf32, #tpu.memory_space<vmem>>) attributes {dimension_semantics = [#tpu.dimension_semantics<arbitrary>], iteration_bounds = array<i64: 4>, scalar_prefetch = 0 : i64, scratch_operands = 0 : i64, tpu.core_type = #tpu.core_type<tc>, window_params = [{transform_indices = @transform_0, window_bounds = array<i64: 128, 128>}, {pipeline_mode = #tpu.pipeline_mode<synchronous>, transform_indices = @transform_1, window_bounds = array<i64: 128, 128>}, {transform_indices = @transform_2, window_bounds = array<i64: 128, 128>}, {pipeline_mode = #tpu.pipeline_mode<synchronous>, transform_indices = @transform_3, window_bounds = array<i64: 8, 128>}, {pipeline_mode = #tpu.pipeline_mode<synchronous>, transform_indices = @transform_4, window_bounds = array<i64: 8, 128>}]} {
    %c0_i32 = arith.constant 0 : i32
    %0 = arith.cmpi eq, %arg0, %c0_i32 : i32
    %1 = arith.extui %0 : i1 to i32
    %c0_i32_0 = arith.constant 0 : i32
    %2 = arith.cmpi ne, %1, %c0_i32_0 : i32
    scf.if %2 {
      %cst_14 = arith.constant 0.000000e+00 : f32
      %38 = vector.broadcast %cst_14 : f32 to vector<8x128xf32>
      %c0_15 = arith.constant 0 : index
      %c0_16 = arith.constant 0 : index
      %39 = vector.load %arg4[%c0_15, %c0_16] : memref<8x128xf32, #tpu.memory_space<vmem>>, vector<8x128xf32>
      tpu.vector_store %arg4[%c0_15, %c0_16], %38 {strides = array<i32>} : memref<8x128xf32, #tpu.memory_space<vmem>>, vector<8x128xf32>,
      %cst_17 = arith.constant 0.000000e+00 : f32
      %40 = vector.broadcast %cst_17 : f32 to vector<8x128xf32>
      %c0_18 = arith.constant 0 : index
      %c0_19 = arith.constant 0 : index
      %41 = vector.load %arg5[%c0_18, %c0_19] : memref<8x128xf32, #tpu.memory_space<vmem>>, vector<8x128xf32>
      tpu.vector_store %arg5[%c0_18, %c0_19], %40 {strides = array<i32>} : memref<8x128xf32, #tpu.memory_space<vmem>>, vector<8x128xf32>,
    } else {
    }
    %c0 = arith.constant 0 : index
    %c0_1 = arith.constant 0 : index
    %3 = vector.load %arg1[%c0, %c0_1] : memref<128x128xbf16, #tpu.memory_space<vmem>>, vector<128x128xbf16>
    %c0_2 = arith.constant 0 : index
    %c0_3 = arith.constant 0 : index
    %4 = vector.load %arg2[%c0_2, %c0_3] : memref<128x128xbf16, #tpu.memory_space<vmem>>, vector<128x128xbf16>
    %cst = arith.constant dense<0.000000e+00> : vector<128x128xf32>
    %5 = tpu.matmul %3, %4, %cst {dimension_numbers = #tpu.dot_dimension_numbers<[1], [0], [0], [1], [0, 0, 1, 1], [], []>} : vector<128x128xbf16>, vector<128x128xbf16>, vector<128x128xf32> -> vector<128x128xf32>
    %c0_4 = arith.constant 0 : index
    %c0_5 = arith.constant 0 : index
    %6 = vector.load %arg3[%c0_4, %c0_5] : memref<128x128xf32, #tpu.memory_space<vmem>>, vector<128x128xf32>
    tpu.vector_store %arg3[%c0_4, %c0_5], %5 {strides = array<i32>} : memref<128x128xf32, #tpu.memory_space<vmem>>, vector<128x128xf32>,
    %c0_6 = arith.constant 0 : index
    %c0_7 = arith.constant 0 : index
    %7 = vector.load %arg4[%c0_6, %c0_7] : memref<8x128xf32, #tpu.memory_space<vmem>>, vector<8x128xf32>
    %8 = vector.extract_strided_slice %5 {offsets = [0, 0], sizes = [64, 128], strides = [1, 1]} : vector<128x128xf32> to vector<64x128xf32>
    %9 = vector.extract_strided_slice %5 {offsets = [64, 0], sizes = [64, 128], strides = [1, 1]} : vector<128x128xf32> to vector<64x128xf32>
    %10 = arith.addf %8, %9 : vector<64x128xf32>
    %11 = vector.extract_strided_slice %10 {offsets = [0, 0], sizes = [32, 128], strides = [1, 1]} : vector<64x128xf32> to vector<32x128xf32>
    %12 = vector.extract_strided_slice %10 {offsets = [32, 0], sizes = [32, 128], strides = [1, 1]} : vector<64x128xf32> to vector<32x128xf32>
    %13 = arith.addf %11, %12 : vector<32x128xf32>
    %14 = vector.extract_strided_slice %13 {offsets = [0, 0], sizes = [16, 128], strides = [1, 1]} : vector<32x128xf32> to vector<16x128xf32>
    %15 = vector.extract_strided_slice %13 {offsets = [16, 0], sizes = [16, 128], strides = [1, 1]} : vector<32x128xf32> to vector<16x128xf32>
    %16 = arith.addf %14, %15 : vector<16x128xf32>
    %17 = vector.extract_strided_slice %16 {offsets = [0, 0], sizes = [8, 128], strides = [1, 1]} : vector<16x128xf32> to vector<8x128xf32>
    %18 = vector.extract_strided_slice %16 {offsets = [8, 0], sizes = [8, 128], strides = [1, 1]} : vector<16x128xf32> to vector<8x128xf32>
    %19 = arith.addf %17, %18 : vector<8x128xf32>
    %20 = arith.addf %7, %19 : vector<8x128xf32>
    %c0_8 = arith.constant 0 : index
    %c0_9 = arith.constant 0 : index
    %21 = vector.load %arg4[%c0_8, %c0_9] : memref<8x128xf32, #tpu.memory_space<vmem>>, vector<8x128xf32>
    tpu.vector_store %arg4[%c0_8, %c0_9], %20 {strides = array<i32>} : memref<8x128xf32, #tpu.memory_space<vmem>>, vector<8x128xf32>,
    %c0_10 = arith.constant 0 : index
    %c0_11 = arith.constant 0 : index
    %22 = vector.load %arg5[%c0_10, %c0_11] : memref<8x128xf32, #tpu.memory_space<vmem>>, vector<8x128xf32>
    %23 = arith.mulf %5, %5 : vector<128x128xf32>
    %24 = vector.extract_strided_slice %23 {offsets = [0, 0], sizes = [64, 128], strides = [1, 1]} : vector<128x128xf32> to vector<64x128xf32>
    %25 = vector.extract_strided_slice %23 {offsets = [64, 0], sizes = [64, 128], strides = [1, 1]} : vector<128x128xf32> to vector<64x128xf32>
    %26 = arith.addf %24, %25 : vector<64x128xf32>
    %27 = vector.extract_strided_slice %26 {offsets = [0, 0], sizes = [32, 128], strides = [1, 1]} : vector<64x128xf32> to vector<32x128xf32>
    %28 = vector.extract_strided_slice %26 {offsets = [32, 0], sizes = [32, 128], strides = [1, 1]} : vector<64x128xf32> to vector<32x128xf32>
    %29 = arith.addf %27, %28 : vector<32x128xf32>
    %30 = vector.extract_strided_slice %29 {offsets = [0, 0], sizes = [16, 128], strides = [1, 1]} : vector<32x128xf32> to vector<16x128xf32>
    %31 = vector.extract_strided_slice %29 {offsets = [16, 0], sizes = [16, 128], strides = [1, 1]} : vector<32x128xf32> to vector<16x128xf32>
    %32 = arith.addf %30, %31 : vector<16x128xf32>
    %33 = vector.extract_strided_slice %32 {offsets = [0, 0], sizes = [8, 128], strides = [1, 1]} : vector<16x128xf32> to vector<8x128xf32>
    %34 = vector.extract_strided_slice %32 {offsets = [8, 0], sizes = [8, 128], strides = [1, 1]} : vector<16x128xf32> to vector<8x128xf32>
    %35 = arith.addf %33, %34 : vector<8x128xf32>
    %36 = arith.addf %22, %35 : vector<8x128xf32>
    %c0_12 = arith.constant 0 : index
    %c0_13 = arith.constant 0 : index
    %37 = vector.load %arg5[%c0_12, %c0_13] : memref<8x128xf32, #tpu.memory_space<vmem>>, vector<8x128xf32>
    tpu.vector_store %arg5[%c0_12, %c0_13], %36 {strides = array<i32>} : memref<8x128xf32, #tpu.memory_space<vmem>>, vector<8x128xf32>,
    return
  }
  func.func @transform_0(%arg0: i32) -> (i32, i32) {
    %c0_i32 = arith.constant 0 : i32
    %c0_i32_0 = arith.constant 0 : i32
    return %arg0, %c0_i32 : i32, i32
  }
  func.func @transform_1(%arg0: i32) -> (i32, i32) {
    %c0_i32 = arith.constant 0 : i32
    %c0_i32_0 = arith.constant 0 : i32
    %c0_i32_1 = arith.constant 0 : i32
    return %c0_i32, %c0_i32_0 : i32, i32
  }
  func.func @transform_2(%arg0: i32) -> (i32, i32) {
    %c0_i32 = arith.constant 0 : i32
    %c0_i32_0 = arith.constant 0 : i32
    return %arg0, %c0_i32 : i32, i32
  }
  func.func @transform_3(%arg0: i32) -> (i32, i32) {
    %c0_i32 = arith.constant 0 : i32
    %c0_i32_0 = arith.constant 0 : i32
    %c0_i32_1 = arith.constant 0 : i32
    return %c0_i32, %c0_i32_0 : i32, i32
  }
  func.func @transform_4(%arg0: i32) -> (i32, i32) {
    %c0_i32 = arith.constant 0 : i32
    %c0_i32_0 = arith.constant 0 : i32
    %c0_i32_1 = arith.constant 0 : i32
    return %c0_i32, %c0_i32_0 : i32, i32
  }
}

module attributes {stable_mosaic.version = 11 : i64} {
  func.func @_bn_act_kernel(%arg0: i32, %arg1: memref<128x128xf32, #tpu.memory_space<vmem>>, %arg2: memref<1x128xf32, #tpu.memory_space<vmem>>, %arg3: memref<1x128xf32, #tpu.memory_space<vmem>>, %arg4: memref<128x128xf32, #tpu.memory_space<vmem>>) attributes {dimension_semantics = [#tpu.dimension_semantics<parallel>], iteration_bounds = array<i64: 4>, scalar_prefetch = 0 : i64, scratch_operands = 0 : i64, tpu.core_type = #tpu.core_type<tc>, window_params = [{transform_indices = @transform_0, window_bounds = array<i64: 128, 128>}, {pipeline_mode = #tpu.pipeline_mode<synchronous>, transform_indices = @transform_1, window_bounds = array<i64: 1, 128>}, {pipeline_mode = #tpu.pipeline_mode<synchronous>, transform_indices = @transform_2, window_bounds = array<i64: 1, 128>}, {transform_indices = @transform_3, window_bounds = array<i64: 128, 128>}]} {
    %c0 = arith.constant 0 : index
    %c0_0 = arith.constant 0 : index
    %0 = vector.load %arg1[%c0, %c0_0] : memref<128x128xf32, #tpu.memory_space<vmem>>, vector<128x128xf32>
    %c0_1 = arith.constant 0 : index
    %c0_2 = arith.constant 0 : index
    %1 = vector.load %arg2[%c0_1, %c0_2] : memref<1x128xf32, #tpu.memory_space<vmem>>, vector<1x128xf32>
    %2 = vector.broadcast %1 : vector<1x128xf32> to vector<128x128xf32>
    %3 = arith.mulf %0, %2 : vector<128x128xf32>
    %c0_3 = arith.constant 0 : index
    %c0_4 = arith.constant 0 : index
    %4 = vector.load %arg3[%c0_3, %c0_4] : memref<1x128xf32, #tpu.memory_space<vmem>>, vector<1x128xf32>
    %5 = vector.broadcast %4 : vector<1x128xf32> to vector<128x128xf32>
    %6 = arith.addf %3, %5 : vector<128x128xf32>
    %cst = arith.constant 0.00999999977 : f32
    %7 = vector.broadcast %cst : f32 to vector<128x128xf32>
    %8 = arith.mulf %7, %6 : vector<128x128xf32>
    %9 = arith.maximumf %6, %8 : vector<128x128xf32>
    %c0_5 = arith.constant 0 : index
    %c0_6 = arith.constant 0 : index
    %10 = vector.load %arg4[%c0_5, %c0_6] : memref<128x128xf32, #tpu.memory_space<vmem>>, vector<128x128xf32>
    tpu.vector_store %arg4[%c0_5, %c0_6], %9 {strides = array<i32>} : memref<128x128xf32, #tpu.memory_space<vmem>>, vector<128x128xf32>,
    return
  }
  func.func @transform_0(%arg0: i32) -> (i32, i32) {
    %c0_i32 = arith.constant 0 : i32
    %c0_i32_0 = arith.constant 0 : i32
    return %arg0, %c0_i32 : i32, i32
  }
  func.func @transform_1(%arg0: i32) -> (i32, i32) {
    %c0_i32 = arith.constant 0 : i32
    %c0_i32_0 = arith.constant 0 : i32
    %c0_i32_1 = arith.constant 0 : i32
    return %c0_i32, %c0_i32_0 : i32, i32
  }
  func.func @transform_2(%arg0: i32) -> (i32, i32) {
    %c0_i32 = arith.constant 0 : i32
    %c0_i32_0 = arith.constant 0 : i32
    %c0_i32_1 = arith.constant 0 : i32
    return %c0_i32, %c0_i32_0 : i32, i32
  }
  func.func @transform_3(%arg0: i32) -> (i32, i32) {
    %c0_i32 = arith.constant 0 : i32
    %c0_i32_0 = arith.constant 0 : i32
    return %arg0, %c0_i32 : i32, i32
  }
}

</mosaic_0001>

<bundles_post_ra>
// kernel: conv_block_forward.3
= control target key start
LH: loop header
LB: loop body
LE: loop exit
PB: predicated region body
PF: predicated region fallthrough
CT: control target
= control target key end

     0   :  { %s383_s12 = smov 0   ;;  %s485_s0 = inlined_call_operand.vmem [shape: f32[512,128], index: 0, kind: input, shape index: {}]   ;;  %s486_s1 = inlined_call_operand.vmem [shape: f32[1,128], index: 1, kind: input, shape index: {}]   ;;  %s487_s2 = inlined_call_operand.vmem [shape: f32[1,128], index: 2, kind: input, shape index: {}]   ;;  %s488_s3 = inlined_call_operand.vmem [shape: f32[512,128], index: 3, kind: output, shape index: {}]  }
   0x1 LB: > { %s334_s13 = sadd.s32 4294967295, %s361_s12   ;;  %p338_p0 = scmp.ge.s32.totalorder %s361_s12, 1  ;;  %s361_s12 = sphi %s383_s12, %s13_s12  }
   0x2   : > { %p138_p1 = scmp.lt.s32.totalorder %s361_s12, 5 }
   0x4   : > { %p139_p2 = pnand %p338_p0, %p138_p1 }
   0x5   : > { %s339_s14 = sshll.u32 (!%p139_p2), %s334_s13, 4 }
   0x6   : > { %142 = sbr.rel (%p139_p2) target bundleno = 39 (0x27), region = 32  ;;  %p163_p3 = scmp.lt.s32.totalorder (!%p139_p2), %s339_s14, 63 }
   0xb   : > { %s490_s14 = smov (!%p163_p3, %s339_s14), 63  ;;  %v396_v0 = vld [vmem:[%s486_s1] ss:$0 sm:$0xff] }
   0xc   : > { %s340_s17 = sshll.u32 %s490_s14, 3  ;;  %v409_v1 = vld [vmem:[%s487_s2] ss:$0 sm:$0xff] }
   0xd   : > { %s404_s20 = scalar_lea.vmem %s485_s0, %s340_s17  ;;  %s442_s25 = scalar_lea.vmem %s488_s3, %s340_s17 }
   0xe   : > { %v174_v2 = vld [vmem:[%s404_s20] sm:$0xff]  ;;  %v175_v3 = vld [vmem:[%s404_s20 + $0x8] sm:$0xff]  ;;  %v176_v4 = vld [vmem:[%s404_s20 + $0x10] sm:$0xff] }
   0xf   : > { %v194_v5 = vmul.f32 %v396_v0, %v174_v2  ;;  %v195_v6 = vmul.f32 %v396_v0, %v175_v3  ;;  %v196_v7 = vmul.f32 %v396_v0, %v176_v4  ;;  %v177_v8 = vld [vmem:[%s404_s20 + $0x18] sm:$0xff]  ;;  %v178_v9 = vld [vmem:[%s404_s20 + $0x20] sm:$0xff]  ;;  %v179_v10 = vld [vmem:[%s404_s20 + $0x28] sm:$0xff] }
  0x10   : > { %v197_v11 = vmul.f32 %v396_v0, %v177_v8  ;;  %v198_v12 = vmul.f32 %v396_v0, %v178_v9  ;;  %v199_v13 = vmul.f32 %v396_v0, %v179_v10  ;;  %v180_v14 = vld [vmem:[%s404_s20 + $0x30] sm:$0xff]  ;;  %v181_v15 = vld [vmem:[%s404_s20 + $0x38] sm:$0xff]  ;;  %v182_v24 = vld [vmem:[%s404_s20 + $0x40] sm:$0xff] }
  0x11   : > { %v214_v16 = vadd.f32 %v409_v1, %v194_v5  ;;  %v215_v17 = vadd.f32 %v409_v1, %v195_v6  ;;  %v216_v18 = vadd.f32 %v409_v1, %v196_v7  ;;  %v200_v19 = vmul.f32 %v396_v0, %v180_v14  ;;  %v183_v25 = vld [vmem:[%s404_s20 + $0x48] sm:$0xff]  ;;  %v184_v26 = vld [vmem:[%s404_s20 + $0x50] sm:$0xff]  ;;  %v185_v39 = vld [vmem:[%s404_s20 + $0x58] sm:$0xff] }
  0x12   : > { %v217_v20 = vadd.f32 %v409_v1, %v197_v11  ;;  %v218_v21 = vadd.f32 %v409_v1, %v198_v12  ;;  %v219_v22 = vadd.f32 %v409_v1, %v199_v13  ;;  %v201_v23 = vmul.f32 %v396_v0, %v181_v15  ;;  %v186_v40 = vld [vmem:[%s404_s20 + $0x60] sm:$0xff]  ;;  %v187_v41 = vld [vmem:[%s404_s20 + $0x68] sm:$0xff]  ;;  %v188_v46 = vld [vmem:[%s404_s20 + $0x70] sm:$0xff] }
  0x13   : > { %v230_v27 = vmul.f32 0.01, %v214_v16  ;;  %v231_v28 = vmul.f32 0.01, %v215_v17  ;;  %v232_v29 = vmul.f32 0.01, %v216_v18  ;;  %v220_v30 = vadd.f32 %v409_v1, %v200_v19 }
  0x14   : > { %v233_v31 = vmul.f32 0.01, %v217_v20  ;;  %v234_v32 = vmul.f32 0.01, %v218_v21  ;;  %v235_v33 = vmul.f32 0.01, %v219_v22  ;;  %v221_v34 = vadd.f32 %v409_v1, %v201_v23 }
  0x15   : > { %v246_v35 = vmax.f32 %v214_v16, %v230_v27  ;;  %v247_v36 = vmax.f32 %v215_v17, %v231_v28  ;;  %v248_v37 = vmax.f32 %v216_v18, %v232_v29  ;;  %v236_v38 = vmul.f32 0.01, %v220_v30  ;;  %v189_v51 = vld [vmem:[%s404_s20 + $0x78] sm:$0xff] }
  0x16   : > { %v249_v42 = vmax.f32 %v217_v20, %v233_v31  ;;  %v250_v43 = vmax.f32 %v218_v21, %v234_v32  ;;  %v251_v44 = vmax.f32 %v219_v22, %v235_v33  ;;  %v237_v45 = vmul.f32 0.01, %v221_v34 }
  0x17   : > { %262 = vst [vmem:[%s442_s25] sm:$0xff] %v246_v35  ;;  %v252_v47 = vmax.f32 %v220_v30, %v236_v38  ;;  %v202_v48 = vmul.f32 %v396_v0, %v182_v24  ;;  %v203_v49 = vmul.f32 %v396_v0, %v183_v25  ;;  %v204_v50 = vmul.f32 %v396_v0, %v184_v26 }
  0x18   : > { %263 = vst [vmem:[%s442_s25 + $0x8] sm:$0xff] %v247_v36  ;;  %v253_v52 = vmax.f32 %v221_v34, %v237_v45  ;;  %v205_v53 = vmul.f32 %v396_v0, %v185_v39  ;;  %v206_v54 = vmul.f32 %v396_v0, %v186_v40  ;;  %v207_v55 = vmul.f32 %v396_v0, %v187_v41 }
  0x19   : > { %264 = vst [vmem:[%s442_s25 + $0x10] sm:$0xff] %v248_v37  ;;  %v222_v56 = vadd.f32 %v409_v1, %v202_v48  ;;  %v223_v57 = vadd.f32 %v409_v1, %v203_v49  ;;  %v224_v58 = vadd.f32 %v409_v1, %v204_v50  ;;  %v208_v59 = vmul.f32 %v396_v0, %v188_v46 }
  0x1a   : > { %265 = vst [vmem:[%s442_s25 + $0x18] sm:$0xff] %v249_v42  ;;  %v225_v60 = vadd.f32 %v409_v1, %v205_v53  ;;  %v226_v61 = vadd.f32 %v409_v1, %v206_v54  ;;  %v227_v62 = vadd.f32 %v409_v1, %v207_v55  ;;  %v209_v63 = vmul.f32 %v396_v0, %v189_v51 }
  0x1b   : > { %266 = vst [vmem:[%s442_s25 + $0x20] sm:$0xff] %v250_v43  ;;  %v238_v2 = vmul.f32 0.01, %v222_v56  ;;  %v239_v3 = vmul.f32 0.01, %v223_v57  ;;  %v228_v4 = vadd.f32 %v409_v1, %v208_v59 }
  0x1c   : > { %267 = vst [vmem:[%s442_s25 + $0x28] sm:$0xff] %v251_v44  ;;  %v240_v5 = vmul.f32 0.01, %v224_v58  ;;  %v241_v6 = vmul.f32 0.01, %v225_v60  ;;  %v229_v7 = vadd.f32 %v409_v1, %v209_v63 }
  0x1d   : > { %268 = vst [vmem:[%s442_s25 + $0x30] sm:$0xff] %v252_v47  ;;  %v254_v8 = vmax.f32 %v222_v56, %v238_v2  ;;  %v255_v9 = vmax.f32 %v223_v57, %v239_v3  ;;  %v242_v10 = vmul.f32 0.01, %v226_v61  ;;  %v243_v0 = vmul.f32 0.01, %v227_v62 }
  0x1e   : > { %269 = vst [vmem:[%s442_s25 + $0x38] sm:$0xff] %v253_v52  ;;  %v256_v11 = vmax.f32 %v224_v58, %v240_v5  ;;  %v257_v12 = vmax.f32 %v225_v60, %v241_v6  ;;  %v244_v13 = vmul.f32 0.01, %v228_v4  ;;  %v245_v14 = vmul.f32 0.01, %v229_v7 }
  0x1f   : > { %270 = vst [vmem:[%s442_s25 + $0x40] sm:$0xff] %v254_v8  ;;  %v258_v15 = vmax.f32 %v226_v61, %v242_v10  ;;  %v259_v16 = vmax.f32 %v227_v62, %v243_v0 }
  0x20   : > { %271 = vst [vmem:[%s442_s25 + $0x48] sm:$0xff] %v255_v9  ;;  %v260_v1 = vmax.f32 %v228_v4, %v244_v13  ;;  %v261_v17 = vmax.f32 %v229_v7, %v245_v14 }
  0x21   : > { %272 = vst [vmem:[%s442_s25 + $0x50] sm:$0xff] %v256_v11 }
  0x22   : > { %273 = vst [vmem:[%s442_s25 + $0x58] sm:$0xff] %v257_v12 }
  0x23   : > { %274 = vst [vmem:[%s442_s25 + $0x60] sm:$0xff] %v258_v15 }
  0x24   : > { %275 = vst [vmem:[%s442_s25 + $0x68] sm:$0xff] %v259_v16 }
  0x25   : > { %276 = vst [vmem:[%s442_s25 + $0x70] sm:$0xff] %v260_v1 }
  0x26   : > { %277 = vst [vmem:[%s442_s25 + $0x78] sm:$0xff] %v261_v17 }
  0x27 PF: > { %s13_s12 = sadd.s32 1, %s361_s12  }
  0x28   : > { %p10_p4 = scmp.ge.s32.totalorder %s13_s12, 6  }
  0x2a   :  { %12 = sbr.rel (!%p10_p4) target bundleno = 1 (0x1), region = 62 }

// kernel: conv_block_forward.2
= control target key start
LH: loop header
LB: loop body
LE: loop exit
PB: predicated region body
PF: predicated region fallthrough
CT: control target
= control target key end

     0   :  { %s674_s15 = smov 0   ;;  %s761_s0 = inlined_call_operand.vmem [shape: bf16[512,128], index: 0, kind: input, shape index: {}]   ;;  %s762_s1 = inlined_call_operand.vmem [shape: bf16[128,128], index: 1, kind: input, shape index: {}]   ;;  %s763_s2 = inlined_call_operand.vmem [shape: f32[512,128], index: 2, kind: output, shape index: {0}]   ;;  %s764_s3 = inlined_call_operand.vmem [shape: f32[8,128], index: 3, kind: output, shape index: {1}]   ;;  %s765_s4 = inlined_call_operand.vmem [shape: f32[8,128], index: 4, kind: output, shape index: {2}]  }
   0x1 LB: > { %s515_s16 = sadd.s32 4294967295, %s646_s15   ;;  %p519_p0 = scmp.ge.s32.totalorder %s646_s15, 1  ;;  %s646_s15 = sphi %s674_s15, %s15_s15  }
   0x2   : > { %p158_p1 = scmp.lt.s32.totalorder %s646_s15, 5 }
   0x4   : > { %p159_p2 = pnand %p519_p0, %p158_p1 }
   0x5   : > { %s520_s17 = sshll.u32 (!%p159_p2), %s515_s16, 4  ;;  %p524_p4 = scmp.ne.s32.totalorder (!%p159_p2), %s515_s16, 0 }
   0x6   : > { %162 = sbr.rel (%p159_p2) target bundleno = 221 (0xdd), region = 28  ;;  %p185_p3 = scmp.lt.s32.totalorder (!%p159_p2), %s520_s17, 63 }
   0xb   : > { %s767_s17 = smov (!%p185_p3, %s520_s17), 63  ;;  %199 = sbr.rel (%p524_p4) target bundleno = 19 (0x13), region = 32 }
   0xc   : > { %s521_s18 = sshll.u32 %s767_s17, 2  ;;  %s523_s19 = sshll.u32 %s767_s17, 3 }
   0xd   : > { %s685_s22 = scalar_lea.vmem %s761_s0, %s521_s18  ;;  %s690_s25 = scalar_lea.vmem %s763_s2, %s523_s19 }
  0x10   : > { %v648_v0 = vmov 0.0  }
  0x11   : > { %200 = vst [vmem:[%s764_s3] sm:$0xff] %v648_v0 }
  0x12   : > { %201 = vst [vmem:[%s765_s4] sm:$0xff] %v648_v0 }
  0x13 PF: > { %v606_v1 = vld [vmem:[%s762_s1 + $0x38] sm:$0xff]  ;;  %v605_v2 = vld [vmem:[%s762_s1 + $0x30] sm:$0xff]  ;;  %v604_v3 = vld [vmem:[%s762_s1 + $0x28] sm:$0xff] }
  0x14   : > { %330 = vmatpush.bf16.msra.mxu0 %v606_v1  ;;  %607 = vmatpush.bf16.msra.mxu1 %v606_v1  ;;  %v603_v4 = vld [vmem:[%s762_s1 + $0x20] sm:$0xff]  ;;  %v602_v5 = vld [vmem:[%s762_s1 + $0x18] sm:$0xff]  ;;  %v601_v6 = vld [vmem:[%s762_s1 + $0x10] sm:$0xff] }
  0x15   : > { %608 = vmatpush.bf16.msra.mxu2 %v606_v1  ;;  %609 = vmatpush.bf16.msra.mxu3 %v606_v1  ;;  %v600_v7 = vld [vmem:[%s762_s1 + $0x8] sm:$0xff]  ;;  %v599_v8 = vld [vmem:[%s762_s1] sm:$0xff]  ;;  %v593_v10 = vld [vmem:[%s685_s22 + $0x10] sm:$0xff] }
  0x16   : > { %v591_v9 = vld [vmem:[%s685_s22] sm:$0xff]  ;;  %v597_v12 = vld [vmem:[%s685_s22 + $0x30] sm:$0xff]  ;;  %v592_v13 = vld [vmem:[%s685_s22 + $0x8] sm:$0xff] }
  0x17   : > { %v595_v11 = vld [vmem:[%s685_s22 + $0x20] sm:$0xff]  ;;  %v594_v14 = vld [vmem:[%s685_s22 + $0x18] sm:$0xff]  ;;  %v596_v15 = vld [vmem:[%s685_s22 + $0x28] sm:$0xff] }
  0x18   : > { %331 = vmatpush.bf16.msra.mxu0 %v605_v2  ;;  %610 = vmatpush.bf16.msra.mxu1 %v605_v2  ;;  %v598_v16 = vld [vmem:[%s685_s22 + $0x38] sm:$0xff] }
  0x19   : > { %611 = vmatpush.bf16.msra.mxu2 %v605_v2  ;;  %612 = vmatpush.bf16.msra.mxu3 %v605_v2 }
  0x1c   : > { %332 = vmatpush.bf16.msra.mxu0 %v604_v3  ;;  %613 = vmatpush.bf16.msra.mxu1 %v604_v3 }
  0x1d   : > { %614 = vmatpush.bf16.msra.mxu2 %v604_v3  ;;  %615 = vmatpush.bf16.msra.mxu3 %v604_v3 }
  0x20   : > { %333 = vmatpush.bf16.msra.mxu0 %v603_v4  ;;  %616 = vmatpush.bf16.msra.mxu1 %v603_v4 }
  0x21   : > { %617 = vmatpush.bf16.msra.mxu2 %v603_v4  ;;  %618 = vmatpush.bf16.msra.mxu3 %v603_v4 }
  0x24   : > { %334 = vmatpush.bf16.msra.mxu0 %v602_v5  ;;  %619 = vmatpush.bf16.msra.mxu1 %v602_v5 }
  0x25   : > { %620 = vmatpush.bf16.msra.mxu2 %v602_v5  ;;  %621 = vmatpush.bf16.msra.mxu3 %v602_v5 }
  0x28   : > { %335 = vmatpush.bf16.msra.mxu0 %v601_v6  ;;  %622 = vmatpush.bf16.msra.mxu1 %v601_v6 }
  0x29   : > { %623 = vmatpush.bf16.msra.mxu2 %v601_v6  ;;  %624 = vmatpush.bf16.msra.mxu3 %v601_v6 }
  0x2c   : > { %336 = vmatpush.bf16.msra.mxu0 %v600_v7  ;;  %625 = vmatpush.bf16.msra.mxu1 %v600_v7 }
  0x2d   : > { %626 = vmatpush.bf16.msra.mxu2 %v600_v7  ;;  %627 = vmatpush.bf16.msra.mxu3 %v600_v7 }
  0x30   : > { %337 = vmatpush.bf16.msra.mxu0 %v599_v8  ;;  %628 = vmatpush.bf16.msra.mxu1 %v599_v8 }
  0x31   : > { %629 = vmatpush.bf16.msra.mxu2 %v599_v8  ;;  %630 = vmatpush.bf16.msra.mxu3 %v599_v8 }
  0x33   : > { %338 = vmatmul.bf16.vlgmr.msra.gmra.mxu0 %v591_v9  ;;  %348 = vmatmul.bf16.vlgmr.msra.gmra.mxu1 %v593_v10 }
  0x34   : > { %358 = vmatmul.bf16.vlgmr.msra.gmra.mxu2 %v595_v11  ;;  %368 = vmatmul.bf16.vlgmr.msra.gmra.mxu3 %v597_v12  ;;  %v395_v11 = vld [vmem:[%s764_s3] sm:$0xff] }
  0x43   : > { %343 = vmatmul.bf16.gmra.mxu0 %v592_v13  ;;  %353 = vmatmul.bf16.gmra.mxu1 %v594_v14 }
  0x44   : > { %363 = vmatmul.bf16.gmra.mxu2 %v596_v15  ;;  %373 = vmatmul.bf16.gmra.mxu3 %v598_v16  ;;  %v413_v15 = vld [vmem:[%s765_s4] sm:$0xff] }
  0xb0   : > { %v339_v17 = vpop.f32.mrf.mxu0  ;;  %v349_v18 = vpop.f32.mrf.mxu1 }
  0xb1   : > { %379 = vst [vmem:[%s690_s25] sm:$0xff] %v339_v17  ;;  %v414_v29 = vmul.f32 %v339_v17, %v339_v17  ;;  %v418_v32 = vmul.f32 %v349_v18, %v349_v18 }
  0xb2   : > { %383 = vst [vmem:[%s690_s25 + $0x20] sm:$0xff] %v349_v18 }
  0xb7   : > { %v359_v19 = vpop.f32.mrf.mxu2  ;;  %v369_v20 = vpop.f32.mrf.mxu3 }
  0xb8   : > { %387 = vst [vmem:[%s690_s25 + $0x40] sm:$0xff] %v359_v19  ;;  %v341_v21 = vpop.f32.mrf.mxu0  ;;  %v351_v22 = vpop.f32.mrf.mxu1  ;;  %v422_v33 = vmul.f32 %v359_v19, %v359_v19  ;;  %v426_v34 = vmul.f32 %v369_v20, %v369_v20  ;;  %v396_v43 = vadd.f32 %v359_v19, %v339_v17  ;;  %v400_v44 = vadd.f32 %v369_v20, %v349_v18 }
  0xb9   : > { %391 = vst [vmem:[%s690_s25 + $0x60] sm:$0xff] %v369_v20  ;;  %v415_v45 = vmul.f32 %v341_v21, %v341_v21  ;;  %v419_v47 = vmul.f32 %v351_v22, %v351_v22 }
  0xba   : > { %380 = vst [vmem:[%s690_s25 + $0x8] sm:$0xff] %v341_v21  ;;  %v430_v46 = vadd.f32 %v422_v33, %v414_v29  ;;  %v434_v50 = vadd.f32 %v426_v34, %v418_v32  ;;  %v404_v0 = vadd.f32 %v400_v44, %v396_v43 }
  0xbb   : > { %384 = vst [vmem:[%s690_s25 + $0x28] sm:$0xff] %v351_v22 }
  0xbc   : > { %v438_v6 = vadd.f32 %v434_v50, %v430_v46 }
  0xbf   : > { %v361_v23 = vpop.f32.mrf.mxu2  ;;  %v371_v24 = vpop.f32.mrf.mxu3 }
  0xc0   : > { %388 = vst [vmem:[%s690_s25 + $0x48] sm:$0xff] %v361_v23  ;;  %v344_v25 = vpop.f32.mrf.mxu0  ;;  %v354_v26 = vpop.f32.mrf.mxu1  ;;  %v423_v35 = vmul.f32 %v361_v23, %v361_v23  ;;  %v427_v40 = vmul.f32 %v371_v24, %v371_v24  ;;  %v397_v48 = vadd.f32 %v361_v23, %v341_v21  ;;  %v401_v49 = vadd.f32 %v371_v24, %v351_v22 }
  0xc1   : > { %392 = vst [vmem:[%s690_s25 + $0x68] sm:$0xff] %v371_v24  ;;  %v416_v36 = vmul.f32 %v344_v25, %v344_v25  ;;  %v420_v37 = vmul.f32 %v354_v26, %v354_v26 }
  0xc2   : > { %381 = vst [vmem:[%s690_s25 + $0x10] sm:$0xff] %v344_v25  ;;  %v431_v51 = vadd.f32 %v423_v35, %v415_v45  ;;  %v435_v54 = vadd.f32 %v427_v40, %v419_v47  ;;  %v405_v1 = vadd.f32 %v401_v49, %v397_v48 }
  0xc3   : > { %385 = vst [vmem:[%s690_s25 + $0x30] sm:$0xff] %v354_v26 }
  0xc4   : > { %v439_v7 = vadd.f32 %v435_v54, %v431_v51 }
  0xc7   : > { %v364_v27 = vpop.f32.mrf.mxu2  ;;  %v374_v28 = vpop.f32.mrf.mxu3 }
  0xc8   : > { %389 = vst [vmem:[%s690_s25 + $0x50] sm:$0xff] %v364_v27  ;;  %v346_v30 = vpop.f32.mrf.mxu0  ;;  %v356_v31 = vpop.f32.mrf.mxu1  ;;  %v424_v38 = vmul.f32 %v364_v27, %v364_v27  ;;  %v428_v39 = vmul.f32 %v374_v28, %v374_v28  ;;  %v398_v41 = vadd.f32 %v364_v27, %v344_v25  ;;  %v402_v42 = vadd.f32 %v374_v28, %v354_v26 }
  0xc9   : > { %393 = vst [vmem:[%s690_s25 + $0x70] sm:$0xff] %v374_v28  ;;  %v417_v56 = vmul.f32 %v346_v30, %v346_v30  ;;  %v421_v57 = vmul.f32 %v356_v31, %v356_v31 }
  0xca   : > { %382 = vst [vmem:[%s690_s25 + $0x18] sm:$0xff] %v346_v30  ;;  %v432_v52 = vadd.f32 %v424_v38, %v416_v36  ;;  %v436_v53 = vadd.f32 %v428_v39, %v420_v37  ;;  %v406_v55 = vadd.f32 %v402_v42, %v398_v41 }
  0xcb   : > { %386 = vst [vmem:[%s690_s25 + $0x38] sm:$0xff] %v356_v31 }
  0xcc   : > { %v440_v2 = vadd.f32 %v436_v53, %v432_v52  ;;  %v408_v8 = vadd.f32 %v406_v55, %v404_v0 }
  0xce   : > { %v442_v12 = vadd.f32 %v440_v2, %v438_v6 }
  0xcf   : > { %v366_v58 = vpop.f32.mrf.mxu2  ;;  %v376_v59 = vpop.f32.mrf.mxu3 }
  0xd0   : > { %390 = vst [vmem:[%s690_s25 + $0x58] sm:$0xff] %v366_v58  ;;  %v399_v60 = vadd.f32 %v366_v58, %v346_v30  ;;  %v425_v61 = vmul.f32 %v366_v58, %v366_v58  ;;  %v403_v62 = vadd.f32 %v376_v59, %v356_v31  ;;  %v429_v63 = vmul.f32 %v376_v59, %v376_v59 }
  0xd1   : > { %394 = vst [vmem:[%s690_s25 + $0x78] sm:$0xff] %v376_v59 }
  0xd2   : > { %v433_v3 = vadd.f32 %v425_v61, %v417_v56  ;;  %v407_v4 = vadd.f32 %v403_v62, %v399_v60  ;;  %v437_v5 = vadd.f32 %v429_v63, %v421_v57 }
  0xd4   : > { %v409_v9 = vadd.f32 %v407_v4, %v405_v1  ;;  %v441_v10 = vadd.f32 %v437_v5, %v433_v3 }
  0xd6   : > { %v410_v13 = vadd.f32 %v409_v9, %v408_v8  ;;  %v443_v14 = vadd.f32 %v441_v10, %v439_v7 }
  0xd8   : > { %v411_v16 = vadd.f32 %v410_v13, %v395_v11  ;;  %v444_v17 = vadd.f32 %v443_v14, %v442_v12 }
  0xda   : > { %412 = vst [vmem:[%s764_s3] sm:$0xff] %v411_v16  ;;  %v445_v18 = vadd.f32 %v444_v17, %v413_v15 }
  0xdc   : > { %446 = vst [vmem:[%s765_s4] sm:$0xff] %v445_v18 }
  0xdd PF: > { %s15_s15 = sadd.s32 1, %s646_s15  }
  0xde   : > { %p12_p5 = scmp.ge.s32.totalorder %s15_s15, 6  }
  0xe0   :  { %14 = sbr.rel (!%p12_p5) target bundleno = 1 (0x1), region = 78 }

</bundles_post_ra>
